<compile_context>
chip_gen: v7x
topology: tpu7x:2x2x1
jax: 0.10.0
libtpu: 0.0.40
codegen_flags: <defaults>
</compile_context>

<pallas_src>
import functools

import jax
import jax.numpy as jnp
from jax.experimental import pallas as pl
from jax.experimental.pallas import tpu as pltpu

_LANES = 128
_SUBLANES = 8


def _affine_kernel(w_ref, b_ref, x_ref, o_ref):
    # w_ref: (1,1) f32 in SMEM, b_ref: (1,) f32 in SMEM.
    # x_ref/o_ref: (block_rows, 128) f32 tile in VMEM.
    # Pure streaming elementwise: one load, one FMA-equivalent, one store.
    o_ref[...] = x_ref[...] * w_ref[0, 0] + b_ref[0]


def _pallas_affine(slab, weight, bias, tile_rows, donate_x):
    """slab: (rows, 128) f32 lane-dense view of the flattened input."""
    rows, lanes = slab.shape
    assert lanes == _LANES

    if rows <= tile_rows:
        # Full-array block (allowed even when rows % 8 != 0); grid of 1.
        block_rows = rows
        grid = (1,)
    else:
        # Fixed block; Pallas masks the partial last block's writes.
        block_rows = tile_rows
        grid = (pl.cdiv(rows, tile_rows),)

    itemsize = slab.dtype.itemsize
    tile_bytes = block_rows * _LANES * itemsize
    # Double-buffered input + output, plus slack.  Floor of 16 MiB keeps the
    # v5e scoped default satisfied; cap well under physical VMEM everywhere.
    vmem_limit = int(min(100 * 1024 * 1024,
                         max(16 * 1024 * 1024, 4 * tile_bytes + (2 << 20))))

    n_elems = rows * _LANES
    cost = pl.CostEstimate(flops=2 * n_elems,
                           transcendentals=0,
                           bytes_accessed=2 * n_elems * itemsize)

    return pl.pallas_call(
        _affine_kernel,
        out_shape=jax.ShapeDtypeStruct((rows, _LANES), slab.dtype),
        grid_spec=pltpu.PrefetchScalarGridSpec(
            num_scalar_prefetch=0,
            grid=grid,
            in_specs=[
                pl.BlockSpec(memory_space=pltpu.SMEM),                 # weight (1,1)
                pl.BlockSpec(memory_space=pltpu.SMEM),                 # bias (1,)
                pl.BlockSpec((block_rows, _LANES), lambda i: (i, 0)),  # x tile
            ],
            out_specs=pl.BlockSpec((block_rows, _LANES), lambda i: (i, 0)),
        ),
        compiler_params=pltpu.CompilerParams(
            dimension_semantics=("parallel",),   # only matters on v7x (2 TCs)
            vmem_limit_bytes=vmem_limit,
        ),
        cost_estimate=cost,
        input_output_aliases=({2: 0} if donate_x else {}),
    )(weight, bias, slab)


def linear_regression_forward(x, weight, bias, *, tile_rows=4096,
                              min_pallas_elems=1 << 15, donate_x=False):
    """x: (N, 1) f32, weight: (1, 1) f32, bias: (1,) f32 -> (N, 1) f32.

    tile_rows must be a multiple of 8 (f32 sublane granularity).  The Pallas
    path is used only for N >= min_pallas_elems with N % 128 == 0; otherwise
    the fused XLA expression (already at HBM roofline for this op) is used,
    avoiding any pad/slice copies.  Set donate_x=True only when the caller
    donates x (e.g. jax.jit(..., donate_argnums) or x is an intermediate).
    """
    n, f = x.shape
    assert f == 1 and weight.shape == (1, 1) and bias.shape == (1,)
    assert x.dtype == jnp.float32 and weight.dtype == jnp.float32
    assert bias.dtype == jnp.float32
    assert tile_rows % _SUBLANES == 0

    if n < min_pallas_elems or n % _LANES != 0:
        # XLA fast path: tiny batch (launch/DMA overhead dominates) or
        # lane-unaligned batch (padding would ~double HBM traffic).
        return x * weight[0, 0] + bias[0]

    rows = n // _LANES
    slab = x.reshape(rows, _LANES)          # free metadata reshape, no pad
    out = _pallas_affine(slab, weight, bias, tile_rows, donate_x)
    return out.reshape(n, 1)


if __name__ == "__main__":
    # Deterministic parameters (shapes from nn.Linear(1, 1)).
    weight = jnp.array([[0.75]], dtype=jnp.float32)   # W: (out=1, in=1)
    bias = jnp.array([-0.25], dtype=jnp.float32)      # b: (1,)

    key = jax.random.PRNGKey(0)
    k_small, k_mid, k_big = jax.random.split(key, 3)

    # 1) Tiny batch (batch=8): XLA fast path.
    x_small = jax.random.normal(k_small, (8, 1), dtype=jnp.float32)
    y_small = linear_regression_forward(x_small, weight, bias)
    jax.block_until_ready(y_small)
    assert jnp.allclose(y_small, x_small @ weight.T + bias, atol=1e-6), \
        "small-batch mismatch vs reference"

    # 2) Lane-aligned batch through the Pallas kernel with the production tile
    #    size (single full-array block of (8, 128)).
    x_mid = jax.random.normal(k_mid, (1024, 1), dtype=jnp.float32)
    y_mid = linear_regression_forward(x_mid, weight, bias, min_pallas_elems=0)
    jax.block_until_ready(y_mid)
    assert jnp.allclose(y_mid, x_mid @ weight.T + bias, atol=1e-6), \
        "pallas single-block mismatch vs reference"

    # 3) Multi-step grid with a masked partial last block + donated input
    #    (input_output_aliases under jit).  tile_rows=16 is a CORRECTNESS-ONLY
    #    override so the pipelined/partial-block path is exercised at small
    #    shapes; production keeps the default tile_rows=4096.
    x_big = jax.random.normal(k_big, (4224, 1), dtype=jnp.float32)  # 33 rows
    expected = x_big @ weight.T + bias
    jax.block_until_ready(expected)   # consume x_big before donating it
    fwd = jax.jit(
        functools.partial(linear_regression_forward,
                          tile_rows=16, min_pallas_elems=0, donate_x=True),
        donate_argnums=(0,))
    y_big = fwd(x_big, weight, bias)
    jax.block_until_ready(y_big)
    assert jnp.allclose(y_big, expected, atol=1e-6), \
        "pallas multi-block/aliased mismatch vs reference"

    print("KERNEL_OK")
</pallas_src>

<mosaic_0001>
module attributes {stable_mosaic.version = 11 : i64} {
  func.func @_affine_kernel(%arg0: i32, %arg1: memref<1x1xf32, #tpu.memory_space<smem>>, %arg2: memref<1xf32, #tpu.memory_space<smem>>, %arg3: memref<8x128xf32, #tpu.memory_space<vmem>>, %arg4: memref<8x128xf32, #tpu.memory_space<vmem>>) attributes {dimension_semantics = [#tpu.dimension_semantics<parallel>], iteration_bounds = array<i64: 1>, scalar_prefetch = 0 : i64, scratch_operands = 0 : i64, tpu.core_type = #tpu.core_type<tc>, window_params = [{transform_indices = @transform_0, window_bounds = array<i64: 1, 1>}, {transform_indices = @transform_1, window_bounds = array<i64: 1>}, {transform_indices = @transform_2, window_bounds = array<i64: 8, 128>}, {transform_indices = @transform_3, window_bounds = array<i64: 8, 128>}]} {
    %c0 = arith.constant 0 : index
    %c0_0 = arith.constant 0 : index
    %0 = vector.load %arg3[%c0, %c0_0] : memref<8x128xf32, #tpu.memory_space<vmem>>, vector<8x128xf32>
    %c0_1 = arith.constant 0 : index
    %c0_2 = arith.constant 0 : index
    %1 = memref.load %arg1[%c0_1, %c0_2] : memref<1x1xf32, #tpu.memory_space<smem>>
    %2 = vector.broadcast %1 : f32 to vector<8x128xf32>
    %3 = arith.mulf %0, %2 : vector<8x128xf32>
    %c0_3 = arith.constant 0 : index
    %4 = memref.load %arg2[%c0_3] : memref<1xf32, #tpu.memory_space<smem>>
    %5 = vector.broadcast %4 : f32 to vector<8x128xf32>
    %6 = arith.addf %3, %5 : vector<8x128xf32>
    %c0_4 = arith.constant 0 : index
    %c0_5 = arith.constant 0 : index
    %7 = vector.load %arg4[%c0_4, %c0_5] : memref<8x128xf32, #tpu.memory_space<vmem>>, vector<8x128xf32>
    tpu.vector_store %arg4[%c0_4, %c0_5], %6 {strides = array<i32>} : memref<8x128xf32, #tpu.memory_space<vmem>>, vector<8x128xf32>,
    return
  }
  func.func @transform_0(%arg0: i32) -> (i32, i32) {
    %c0_i32 = arith.constant 0 : i32
    %c0_i32_0 = arith.constant 0 : i32
    %c0_i32_1 = arith.constant 0 : i32
    return %c0_i32, %c0_i32_0 : i32, i32
  }
  func.func @transform_1(%arg0: i32) -> i32 {
    %c0_i32 = arith.constant 0 : i32
    %c0_i32_0 = arith.constant 0 : i32
    return %c0_i32 : i32
  }
  func.func @transform_2(%arg0: i32) -> (i32, i32) {
    %c0_i32 = arith.constant 0 : i32
    %c0_i32_0 = arith.constant 0 : i32
    return %arg0, %c0_i32 : i32, i32
  }
  func.func @transform_3(%arg0: i32) -> (i32, i32) {
    %c0_i32 = arith.constant 0 : i32
    %c0_i32_0 = arith.constant 0 : i32
    return %arg0, %c0_i32 : i32, i32
  }
}

</mosaic_0001>

<bundles_post_ra>
// kernel: tpu_custom_call.1
= control target key start
LH: loop header
LB: loop body
LE: loop exit
PB: predicated region body
PF: predicated region fallthrough
CT: control target
= control target key end

     0   :  { %10 = vsyncpa [#allocation5], 0  ;;  %s154_s0 = inlined_call_operand.<no memory space> [shape: f32[1,1], index: 0, kind: input, shape index: {}]   ;;  %s155_s1 = inlined_call_operand.<no memory space> [shape: f32[1], index: 1, kind: input, shape index: {}]   ;;  %s156_s2 = inlined_call_operand.hbm [shape: f32[8,128], index: 2, kind: input, shape index: {}]   ;;  %s157_s3 = inlined_call_operand.hbm [shape: f32[8,128], index: 3, kind: output, shape index: {}]  }
   0x1   :  { %11 = vsyncpa [#allocation6], 0  ;;  %s102_s12 = smov [#allocation4]   ;;  %s54_s16 = scalar_lea.hbm %s156_s2, 128 }
   0x2   :  { %s22_s13 = sshll.u32 %s102_s12, 4  ;;  %p55_p0 = scmp.ne.s32.totalorder %s156_s2, %s54_s16  ;;  %s23_s13 = int_to_ptr.vmem [resolvable:$true] %s22_s13 }
   0x3   :  { %p58_p1 = scmp.lt.u32.totalorder %s54_s16, %s156_s2 }
   0x5   :  { %p60_p2 = pnand %p58_p1, %p55_p0 }
   0x7   :  { %63 = shalt.err (!%p60_p2)
}
   0x8   :  { %s64_s21 = scalar_lea.vmem %s23_s13, 128  ;;  %p69_p4 = scmp.lt.s32.totalorder %s23_s13, %s23_s13 }
   0x9   :  { %p65_p3 = scmp.ne.s32.totalorder %s23_s13, %s64_s21  ;;  %p70_p5 = scmp.lt.s32.totalorder %s64_s21, %s64_s21 }
   0xb   :  { %p71_p6 = por %p70_p5, %p69_p4 }
   0xd   :  { %p72_p7 = pnand %p71_p6, %p65_p3 }
   0xf   :  { %75 = shalt.err (!%p72_p7)
}
  0x10   :  { %25 = dma.hbm_to_vmem [thread:$0]  %s156_s2, 128, %s23_s13, [#allocation5]  }
  0x11   :  { %98 = dma.done.wait [#allocation5], 128  }
  0x12   :  { %99 = vsyncadd [#allocation5], 4294967168  ;;  %v31_v0 = vstv %s154_s0  ;;  %v29_v1 = vld [vmem:[#allocation4] sm:$0xff]  ;;  %v34_v2 = vstv %s155_s1  ;;  %s103_s28 = smov [#allocation7]  }
  0x13   :  { %s43_s29 = sshll.u32 %s103_s28, 4  ;;  %v32_v3 = vmul.f32 %v31_v0, %v29_v1  ;;  %s44_s29 = int_to_ptr.vmem [resolvable:$true] %s43_s29 }
  0x14   :  { %s76_s30 = scalar_lea.vmem %s44_s29, 128  ;;  %p81_p9 = scmp.lt.s32.totalorder %s44_s29, %s44_s29 }
  0x15   :  { %v35_v4 = vadd.f32 %v34_v2, %v32_v3  ;;  %p77_p8 = scmp.ne.s32.totalorder %s44_s29, %s76_s30  ;;  %p82_p10 = scmp.lt.s32.totalorder %s76_s30, %s76_s30 }
  0x17   :  { %36 = vst [vmem:[#allocation7] sm:$0xff] %v35_v4  ;;  %p83_p11 = por %p82_p10, %p81_p9 }
  0x19   :  { %p84_p12 = pnand %p83_p11, %p77_p8 }
  0x1b   :  { %87 = shalt.err (!%p84_p12)
}
  0x1c   :  { %s88_s4 = scalar_lea.hbm %s157_s3, 128 }
  0x1d   :  { %p89_p13 = scmp.ne.s32.totalorder %s157_s3, %s88_s4  ;;  %p92_p0 = scmp.lt.u32.totalorder %s88_s4, %s157_s3 }
  0x1f   :  { %p94_p1 = pnand %p92_p0, %p89_p13 }
  0x21   :  { %97 = shalt.err (!%p94_p1)
}
  0x22   :  { %46 = dma.vmem_to_hbm [thread:$0]  %s44_s29, 128, %s157_s3, [#allocation6]  }
  0x23   :  { %100 = dma.done.wait [#allocation6], 128  }
  0x24   :  { %101 = vsyncadd [#allocation6], 4294967168 }
  0x25   :  { %50 = vsyncpa [#allocation5], 1 }
  0x26   :  { %51 = vsyncpa [#allocation6], 1 }

</bundles_post_ra>
